<compile_context>
chip_gen: v7x
topology: tpu7x:2x2x1
jax: 0.10.0
libtpu: 0.0.40
codegen_flags: <defaults>
</compile_context>

<pallas_src>
import functools

import jax
import jax.numpy as jnp
from jax.experimental import pallas as pl
from jax.experimental.pallas import tpu as pltpu


def _round_up(x: int, m: int) -> int:
    return ((x + m - 1) // m) * m


def _cdiv(a: int, b: int) -> int:
    return (a + b - 1) // b


def _device_kind() -> str:
    try:
        return jax.devices()[0].device_kind.lower()
    except Exception:
        return ""


def _default_elementwise_bf16() -> bool:
    # v6e / v7x have a bf16-capable VPU; v5e (and older) do not.
    k = _device_kind()
    return ("v6" in k) or ("v7" in k)


def _two_tensorcores() -> bool:
    # v7x has 2 TensorCores per chip; make the parallel grid axis shardable.
    return "v7" in _device_kind()


def generator_kernel(z_ref, w1_ref, b1_ref, w2_ref, b2_ref, w3_ref, b3_ref,
                     o_ref, *, ew_dtype):
    # z_ref: (tile, z_dim) bf16 batch tile (pre-cast in wrapper).
    # w*_ref: bf16 weights; b1/b2 in ew_dtype; b3 in f32. Constant index_map
    # => weights/biases are DMA'd once and stay resident in VMEM.
    x = z_ref[...]

    h1 = jnp.dot(x, w1_ref[...], preferred_element_type=jnp.float32)
    h1 = jnp.maximum(h1.astype(ew_dtype) + b1_ref[...], 0.0)

    h2 = jnp.dot(h1.astype(jnp.bfloat16), w2_ref[...],
                 preferred_element_type=jnp.float32)
    h2 = jnp.maximum(h2.astype(ew_dtype) + b2_ref[...], 0.0)

    out = jnp.dot(h2.astype(jnp.bfloat16), w3_ref[...],
                  preferred_element_type=jnp.float32) + b3_ref[...]
    o_ref[...] = out.astype(o_ref.dtype)


def prepare_params(params, *, elementwise_bf16=None, lane_pad=128):
    """One-time param prep: bf16 weights, chip-appropriate bias dtype, and
    lane-dense (128-wide, zero-padded) last layer. Returns (prepared, out_dim)."""
    if elementwise_bf16 is None:
        elementwise_bf16 = _default_elementwise_bf16()
    ew_dtype = jnp.bfloat16 if elementwise_bf16 else jnp.float32

    w1, b1, w2, b2, w3, b3 = params
    out_dim = w3.shape[1]
    out_pad = _round_up(out_dim, lane_pad)
    w3p = jnp.pad(w3, ((0, 0), (0, out_pad - out_dim)))  # zero-padded columns
    b3p = jnp.pad(b3, ((0, 0), (0, out_pad - out_dim)))

    prepared = (
        w1.astype(jnp.bfloat16), b1.astype(ew_dtype),
        w2.astype(jnp.bfloat16), b2.astype(ew_dtype),
        w3p.astype(jnp.bfloat16), b3p.astype(jnp.float32),
    )
    return prepared, out_dim


def generator_forward(z, prepared_params, out_dim, *, batch_tile=1024):
    w1, b1, w2, b2, w3, b3 = prepared_params
    B, z_dim = z.shape
    h1_dim = w1.shape[1]
    h2_dim = w2.shape[1]
    out_pad = w3.shape[1]          # lane-dense padded output width (e.g. 128)
    ew_dtype = b1.dtype            # elementwise dtype chosen at prep time

    # Balanced tiling: split B into n_steps roughly-equal 8-aligned tiles so the
    # last tile is never mostly padding.  On v7x keep an even (>=2) grid for
    # large batches so both TensorCores get work via the "parallel" axis.
    n_steps = max(1, _cdiv(B, batch_tile))
    if _two_tensorcores() and B >= 1024:
        n_steps = max(2, n_steps)
        n_steps += n_steps % 2
    tile = _round_up(_cdiv(B, n_steps), 8)
    B_pad = n_steps * tile

    zb = z.astype(jnp.bfloat16)    # bf16 input DMA; MXU consumes bf16 anyway
    if B_pad != B:
        zb = jnp.pad(zb, ((0, B_pad - B), (0, 0)))

    def batch_map(i):
        return (i, 0)

    def const_map(i):
        # Constant block index => fetched once, resident in VMEM across steps.
        return (0, 0)

    weight_bytes = 2 * (z_dim * h1_dim + h1_dim * h2_dim + h2_dim * out_pad)
    bias_bytes = jnp.dtype(ew_dtype).itemsize * (h1_dim + h2_dim) + 4 * out_pad
    cost = pl.CostEstimate(
        flops=2 * B_pad * (z_dim * h1_dim + h1_dim * h2_dim + h2_dim * out_pad),
        transcendentals=0,
        bytes_accessed=2 * B_pad * z_dim + 4 * B_pad * out_pad
        + weight_bytes + bias_bytes,
    )

    kernel = functools.partial(generator_kernel, ew_dtype=ew_dtype)

    out = pl.pallas_call(
        kernel,
        out_shape=jax.ShapeDtypeStruct((B_pad, out_pad), jnp.float32),
        grid_spec=pl.GridSpec(
            grid=(n_steps,),
            in_specs=[
                pl.BlockSpec((tile, z_dim), batch_map),       # z tile (bf16)
                pl.BlockSpec((z_dim, h1_dim), const_map),     # w1 (bf16)
                pl.BlockSpec((1, h1_dim), const_map),         # b1 (ew_dtype)
                pl.BlockSpec((h1_dim, h2_dim), const_map),    # w2 (bf16)
                pl.BlockSpec((1, h2_dim), const_map),         # b2 (ew_dtype)
                pl.BlockSpec((h2_dim, out_pad), const_map),   # w3 padded (bf16)
                pl.BlockSpec((1, out_pad), const_map),        # b3 padded (f32)
            ],
            out_specs=pl.BlockSpec((tile, out_pad), batch_map),
        ),
        compiler_params=pltpu.CompilerParams(
            dimension_semantics=("parallel",),
        ),
        cost_estimate=cost,
    )(zb, w1, b1, w2, b2, w3, b3)

    # Drop batch padding rows and the zero-padded output columns.
    return out[:B, :out_dim]


def init_params(key, z_dim, output_dim):
    # Deterministic synthetic init (PyTorch-style uniform fan-in scaling).
    ks = jax.random.split(key, 6)

    def linear(kw, kb, fan_in, fan_out):
        bound = 1.0 / jnp.sqrt(fan_in)
        w = jax.random.uniform(kw, (fan_in, fan_out), jnp.float32, -bound, bound)
        b = jax.random.uniform(kb, (1, fan_out), jnp.float32, -bound, bound)
        return w, b

    w1, b1 = linear(ks[0], ks[1], z_dim, 128)
    w2, b2 = linear(ks[2], ks[3], 128, 256)
    w3, b3 = linear(ks[4], ks[5], 256, output_dim)
    return (w1, b1, w2, b2, w3, b3)


def reference_forward_matched(z, params, elementwise_bf16):
    # Same numerics as the kernel: bf16 matmul operands, f32 accumulation,
    # bias add / ReLU in the same elementwise dtype as the kernel.
    ew = jnp.bfloat16 if elementwise_bf16 else jnp.float32
    w1, b1, w2, b2, w3, b3 = params

    def mm(x, w):
        return jnp.dot(x.astype(jnp.bfloat16), w.astype(jnp.bfloat16),
                       preferred_element_type=jnp.float32)

    h1 = jnp.maximum(mm(z, w1).astype(ew) + b1.astype(ew), 0.0)
    h2 = jnp.maximum(mm(h1, w2).astype(ew) + b2.astype(ew), 0.0)
    return mm(h2, w3) + b3


def reference_forward_f32(z, params):
    w1, b1, w2, b2, w3, b3 = params
    h1 = jnp.maximum(z @ w1 + b1, 0.0)
    h2 = jnp.maximum(h1 @ w2 + b2, 0.0)
    return h2 @ w3 + b3


if __name__ == "__main__":
    z_dim = 10
    output_dim = 32
    batch = 16   # small demo shape; arbitrary batches work (balanced tiling + pad)

    key = jax.random.PRNGKey(0)
    k_z, k_p = jax.random.split(key)

    z = jax.random.normal(k_z, (batch, z_dim), dtype=jnp.float32)
    params = init_params(k_p, z_dim, output_dim)

    ew_bf16 = _default_elementwise_bf16()
    prepared, out_dim = prepare_params(params, elementwise_bf16=ew_bf16)

    out = generator_forward(z, prepared, out_dim, batch_tile=1024)
    out = jax.block_until_ready(out)

    ref_matched = reference_forward_matched(z, params, ew_bf16)
    ref_f32 = reference_forward_f32(z, params)

    assert out.shape == (batch, output_dim)
    # Tight vs. matched-numerics (bf16-operand, same elementwise dtype) reference.
    assert jnp.allclose(out, ref_matched, atol=1e-2, rtol=1e-2), \
        "mismatch vs matched reference"
    # Loose vs. the pure-f32 PyTorch-equivalent reference (bf16 rounding).
    assert jnp.allclose(out, ref_f32, atol=6e-2, rtol=6e-2), \
        "mismatch vs f32 reference"

    print("KERNEL_OK")
</pallas_src>

<mosaic_0001>
module attributes {stable_mosaic.version = 11 : i64} {
  func.func @generator_kernel(%arg0: i32, %arg1: memref<16x10xbf16, #tpu.memory_space<vmem>>, %arg2: memref<10x128xbf16, #tpu.memory_space<vmem>>, %arg3: memref<1x128xf32, #tpu.memory_space<vmem>>, %arg4: memref<128x256xbf16, #tpu.memory_space<vmem>>, %arg5: memref<1x256xf32, #tpu.memory_space<vmem>>, %arg6: memref<256x128xbf16, #tpu.memory_space<vmem>>, %arg7: memref<1x128xf32, #tpu.memory_space<vmem>>, %arg8: memref<16x128xf32, #tpu.memory_space<vmem>>) attributes {dimension_semantics = [#tpu.dimension_semantics<parallel>], iteration_bounds = array<i64: 1>, scalar_prefetch = 0 : i64, scratch_operands = 0 : i64, tpu.core_type = #tpu.core_type<tc>, window_params = [{transform_indices = @transform_0, window_bounds = array<i64: 16, 10>}, {pipeline_mode = #tpu.pipeline_mode<synchronous>, transform_indices = @transform_1, window_bounds = array<i64: 10, 128>}, {pipeline_mode = #tpu.pipeline_mode<synchronous>, transform_indices = @transform_2, window_bounds = array<i64: 1, 128>}, {pipeline_mode = #tpu.pipeline_mode<synchronous>, transform_indices = @transform_3, window_bounds = array<i64: 128, 256>}, {pipeline_mode = #tpu.pipeline_mode<synchronous>, transform_indices = @transform_4, window_bounds = array<i64: 1, 256>}, {pipeline_mode = #tpu.pipeline_mode<synchronous>, transform_indices = @transform_5, window_bounds = array<i64: 256, 128>}, {pipeline_mode = #tpu.pipeline_mode<synchronous>, transform_indices = @transform_6, window_bounds = array<i64: 1, 128>}, {transform_indices = @transform_7, window_bounds = array<i64: 16, 128>}]} {
    %c0 = arith.constant 0 : index
    %c0_0 = arith.constant 0 : index
    %0 = vector.load %arg1[%c0, %c0_0] : memref<16x10xbf16, #tpu.memory_space<vmem>>, vector<16x10xbf16>
    %c0_1 = arith.constant 0 : index
    %c0_2 = arith.constant 0 : index
    %1 = vector.load %arg2[%c0_1, %c0_2] : memref<10x128xbf16, #tpu.memory_space<vmem>>, vector<10x128xbf16>
    %cst = arith.constant dense<0.000000e+00> : vector<16x128xf32>
    %2 = tpu.matmul %0, %1, %cst {dimension_numbers = #tpu.dot_dimension_numbers<[1], [0], [0], [1], [0, 0, 1, 1], [], []>} : vector<16x10xbf16>, vector<10x128xbf16>, vector<16x128xf32> -> vector<16x128xf32>
    %c0_3 = arith.constant 0 : index
    %c0_4 = arith.constant 0 : index
    %3 = vector.load %arg3[%c0_3, %c0_4] : memref<1x128xf32, #tpu.memory_space<vmem>>, vector<1x128xf32>
    %4 = vector.broadcast %3 : vector<1x128xf32> to vector<16x128xf32>
    %5 = arith.addf %2, %4 : vector<16x128xf32>
    %cst_5 = arith.constant 0.000000e+00 : f32
    %6 = vector.broadcast %cst_5 : f32 to vector<16x128xf32>
    %7 = arith.maximumf %5, %6 : vector<16x128xf32>
    %8 = arith.truncf %7 : vector<16x128xf32> to vector<16x128xbf16>
    %c0_6 = arith.constant 0 : index
    %c0_7 = arith.constant 0 : index
    %9 = vector.load %arg4[%c0_6, %c0_7] : memref<128x256xbf16, #tpu.memory_space<vmem>>, vector<128x256xbf16>
    %cst_8 = arith.constant dense<0.000000e+00> : vector<16x256xf32>
    %10 = tpu.matmul %8, %9, %cst_8 {dimension_numbers = #tpu.dot_dimension_numbers<[1], [0], [0], [1], [0, 0, 1, 1], [], []>} : vector<16x128xbf16>, vector<128x256xbf16>, vector<16x256xf32> -> vector<16x256xf32>
    %c0_9 = arith.constant 0 : index
    %c0_10 = arith.constant 0 : index
    %11 = vector.load %arg5[%c0_9, %c0_10] : memref<1x256xf32, #tpu.memory_space<vmem>>, vector<1x256xf32>
    %12 = vector.broadcast %11 : vector<1x256xf32> to vector<16x256xf32>
    %13 = arith.addf %10, %12 : vector<16x256xf32>
    %cst_11 = arith.constant 0.000000e+00 : f32
    %14 = vector.broadcast %cst_11 : f32 to vector<16x256xf32>
    %15 = arith.maximumf %13, %14 : vector<16x256xf32>
    %16 = arith.truncf %15 : vector<16x256xf32> to vector<16x256xbf16>
    %c0_12 = arith.constant 0 : index
    %c0_13 = arith.constant 0 : index
    %17 = vector.load %arg6[%c0_12, %c0_13] : memref<256x128xbf16, #tpu.memory_space<vmem>>, vector<256x128xbf16>
    %cst_14 = arith.constant dense<0.000000e+00> : vector<16x128xf32>
    %18 = tpu.matmul %16, %17, %cst_14 {dimension_numbers = #tpu.dot_dimension_numbers<[1], [0], [0], [1], [0, 0, 1, 1], [], []>} : vector<16x256xbf16>, vector<256x128xbf16>, vector<16x128xf32> -> vector<16x128xf32>
    %c0_15 = arith.constant 0 : index
    %c0_16 = arith.constant 0 : index
    %19 = vector.load %arg7[%c0_15, %c0_16] : memref<1x128xf32, #tpu.memory_space<vmem>>, vector<1x128xf32>
    %20 = vector.broadcast %19 : vector<1x128xf32> to vector<16x128xf32>
    %21 = arith.addf %18, %20 : vector<16x128xf32>
    %c0_17 = arith.constant 0 : index
    %c0_18 = arith.constant 0 : index
    %22 = vector.load %arg8[%c0_17, %c0_18] : memref<16x128xf32, #tpu.memory_space<vmem>>, vector<16x128xf32>
    tpu.vector_store %arg8[%c0_17, %c0_18], %21 {strides = array<i32>} : memref<16x128xf32, #tpu.memory_space<vmem>>, vector<16x128xf32>,
    return
  }
  func.func @transform_0(%arg0: i32) -> (i32, i32) {
    %c0_i32 = arith.constant 0 : i32
    %c0_i32_0 = arith.constant 0 : i32
    return %arg0, %c0_i32 : i32, i32
  }
  func.func @transform_1(%arg0: i32) -> (i32, i32) {
    %c0_i32 = arith.constant 0 : i32
    %c0_i32_0 = arith.constant 0 : i32
    %c0_i32_1 = arith.constant 0 : i32
    return %c0_i32, %c0_i32_0 : i32, i32
  }
  func.func @transform_2(%arg0: i32) -> (i32, i32) {
    %c0_i32 = arith.constant 0 : i32
    %c0_i32_0 = arith.constant 0 : i32
    %c0_i32_1 = arith.constant 0 : i32
    return %c0_i32, %c0_i32_0 : i32, i32
  }
  func.func @transform_3(%arg0: i32) -> (i32, i32) {
    %c0_i32 = arith.constant 0 : i32
    %c0_i32_0 = arith.constant 0 : i32
    %c0_i32_1 = arith.constant 0 : i32
    return %c0_i32, %c0_i32_0 : i32, i32
  }
  func.func @transform_4(%arg0: i32) -> (i32, i32) {
    %c0_i32 = arith.constant 0 : i32
    %c0_i32_0 = arith.constant 0 : i32
    %c0_i32_1 = arith.constant 0 : i32
    return %c0_i32, %c0_i32_0 : i32, i32
  }
  func.func @transform_5(%arg0: i32) -> (i32, i32) {
    %c0_i32 = arith.constant 0 : i32
    %c0_i32_0 = arith.constant 0 : i32
    %c0_i32_1 = arith.constant 0 : i32
    return %c0_i32, %c0_i32_0 : i32, i32
  }
  func.func @transform_6(%arg0: i32) -> (i32, i32) {
    %c0_i32 = arith.constant 0 : i32
    %c0_i32_0 = arith.constant 0 : i32
    %c0_i32_1 = arith.constant 0 : i32
    return %c0_i32, %c0_i32_0 : i32, i32
  }
  func.func @transform_7(%arg0: i32) -> (i32, i32) {
    %c0_i32 = arith.constant 0 : i32
    %c0_i32_0 = arith.constant 0 : i32
    return %arg0, %c0_i32 : i32, i32
  }
}

</mosaic_0001>

<bundles_post_ra>
// kernel: tpu_custom_call.1
= control target key start
LH: loop header
LB: loop body
LE: loop exit
PB: predicated region body
PF: predicated region fallthrough
CT: control target
= control target key end

     0   :  { %12 = vsyncpa [#allocation3], 0  ;;  %s892_s0 = inlined_call_operand.hbm [shape: bf16[16,10], index: 0, kind: input, shape index: {}]   ;;  %s893_s1 = inlined_call_operand.hbm [shape: bf16[10,128], index: 1, kind: input, shape index: {}]   ;;  %s894_s2 = inlined_call_operand.vmem [shape: f32[1,128], index: 2, kind: input, shape index: {}]   ;;  %s895_s3 = inlined_call_operand.hbm [shape: bf16[128,256], index: 3, kind: input, shape index: {}]   ;;  %s896_s4 = inlined_call_operand.vmem [shape: f32[1,256], index: 4, kind: input, shape index: {}]   ;;  %s897_s5 = inlined_call_operand.hbm [shape: bf16[256,128], index: 5, kind: input, shape index: {}]   ;;  %s898_s6 = inlined_call_operand.vmem [shape: f32[1,128], index: 6, kind: input, shape index: {}]   ;;  %s899_s7 = inlined_call_operand.hbm [shape: f32[16,128], index: 7, kind: output, shape index: {}]  }
   0x1   :  { %13 = vsyncpa [#allocation6], 0 }
   0x2   :  { %14 = vsyncpa [#allocation9], 0 }
   0x3   :  { %15 = vsyncpa [#allocation4], 0  ;;  %s749_s24 = smov [#allocation5]   ;;  %s750_s26 = smov [#allocation2]  }
   0x4   :  { %s33_s25 = sshll.u32 %s749_s24, 4  ;;  %s21_s27 = sshll.u32 %s750_s26, 4  ;;  %s34_s25 = int_to_ptr.vmem [resolvable:$true] %s33_s25  ;;  %s801_s27 = int_to_ptr.vmem [resolvable:$true] %s21_s27 }
   0x5   :  { %s631_s30 = scalar_lea.hbm %s893_s1, 128 }
   0x6   :  { %p632_p0 = scmp.ne.s32.totalorder %s893_s1, %s631_s30  ;;  %p635_p1 = scmp.lt.u32.totalorder %s631_s30, %s893_s1 }
   0x8   :  { %p637_p2 = pnand %p635_p1, %p632_p0 }
   0xa   :  { %640 = shalt.err (!%p637_p2)
}
   0xb   :  { %s641_s12 = scalar_lea.vmem %s34_s25, 128  ;;  %p646_p4 = scmp.lt.s32.totalorder %s34_s25, %s34_s25 }
   0xc   :  { %p642_p3 = scmp.ne.s32.totalorder %s34_s25, %s641_s12  ;;  %p647_p5 = scmp.lt.s32.totalorder %s641_s12, %s641_s12 }
   0xe   :  { %p648_p6 = por %p647_p5, %p646_p4 }
  0x10   :  { %p649_p7 = pnand %p648_p6, %p642_p3 }
  0x12   :  { %652 = shalt.err (!%p649_p7)
}
  0x13   :  { %s751_s13 = smov 64   ;;  %s752_s14 = smov 4  }
  0x14   :  { %39 = dma.hbm_to_vmem [thread:$0]  %s893_s1, 128, %s34_s25, [#allocation6], %s751_s13, %s751_s13, %s752_s14  }
  0x15   :  { %s653_s19 = scalar_lea.hbm %s892_s0, 128 }
  0x16   :  { %p654_p8 = scmp.ne.s32.totalorder %s892_s0, %s653_s19  ;;  %p657_p9 = scmp.lt.u32.totalorder %s653_s19, %s892_s0 }
  0x18   :  { %p659_p10 = pnand %p657_p9, %p654_p8 }
  0x1a   :  { %662 = shalt.err (!%p659_p10)
}
  0x1b   :  { %s663_s24 = scalar_lea.vmem %s801_s27, 128  ;;  %p668_p12 = scmp.lt.s32.totalorder %s801_s27, %s801_s27 }
  0x1c   :  { %p664_p11 = scmp.ne.s32.totalorder %s801_s27, %s663_s24  ;;  %p669_p13 = scmp.lt.s32.totalorder %s663_s24, %s663_s24 }
  0x1e   :  { %p670_p0 = por %p669_p13, %p668_p12 }
  0x20   :  { %p671_p1 = pnand %p670_p0, %p664_p11 }
  0x22   :  { %674 = shalt.err (!%p671_p1)
}
  0x23   :  { %27 = dma.hbm_to_vmem [thread:$0]  %s892_s0, 128, %s801_s27, [#allocation3], %s751_s13, %s751_s13, %s752_s14  }
  0x24   :  { %s753_s26 = smov [#allocation7]   ;;  %s675_s8 = scalar_lea.hbm %s895_s3, 2048 }
  0x25   :  { %s47_s28 = sshll.u32 %s753_s26, 4  ;;  %p676_p2 = scmp.ne.s32.totalorder %s895_s3, %s675_s8  ;;  %s48_s28 = int_to_ptr.vmem [resolvable:$true] %s47_s28 }
  0x26   :  { %p679_p3 = scmp.lt.u32.totalorder %s675_s8, %s895_s3 }
  0x28   :  { %p681_p4 = pnand %p679_p3, %p676_p2 }
  0x2a   :  { %684 = shalt.err (!%p681_p4)
}
  0x2b   :  { %s685_s15 = scalar_lea.vmem %s48_s28, 2048  ;;  %p690_p6 = scmp.lt.s32.totalorder %s48_s28, %s48_s28 }
  0x2c   :  { %p686_p5 = scmp.ne.s32.totalorder %s48_s28, %s685_s15  ;;  %p691_p7 = scmp.lt.s32.totalorder %s685_s15, %s685_s15 }
  0x2e   :  { %p692_p8 = por %p691_p7, %p690_p6 }
  0x30   :  { %p693_p9 = pnand %p692_p8, %p686_p5 }
  0x32   :  { %696 = shalt.err (!%p693_p9)
}
  0x33   :  { %s754_s0 = smov 128   ;;  %s755_s27 = smov 8  }
  0x34   :  { %53 = dma.hbm_to_vmem [thread:$0]  %s895_s3, 2048, %s48_s28, [#allocation6], %s754_s0, %s754_s0, %s755_s27  }
  0x35   :  { %s756_s18 = smov [#allocation8]   ;;  %s697_s22 = scalar_lea.hbm %s897_s5, 2048 }
  0x36   :  { %s61_s19 = sshll.u32 %s756_s18, 4  ;;  %p698_p10 = scmp.ne.s32.totalorder %s897_s5, %s697_s22  ;;  %s62_s19 = int_to_ptr.vmem [resolvable:$true] %s61_s19 }
  0x37   :  { %p701_p11 = scmp.lt.u32.totalorder %s697_s22, %s897_s5 }
  0x39   :  { %p703_p12 = pnand %p701_p11, %p698_p10 }
  0x3b   :  { %706 = shalt.err (!%p703_p12)
}
  0x3c   :  { %s707_s26 = scalar_lea.vmem %s62_s19, 2048  ;;  %p712_p0 = scmp.lt.s32.totalorder %s62_s19, %s62_s19 }
  0x3d   :  { %p708_p13 = scmp.ne.s32.totalorder %s62_s19, %s707_s26  ;;  %p713_p1 = scmp.lt.s32.totalorder %s707_s26, %s707_s26 }
  0x3f   :  { %p714_p2 = por %p713_p1, %p712_p0 }
  0x41   :  { %p715_p3 = pnand %p714_p2, %p708_p13 }
  0x43   :  { %718 = shalt.err (!%p715_p3)
}
  0x44   :  { %67 = dma.hbm_to_vmem [thread:$0]  %s897_s5, 2048, %s62_s19, [#allocation9], %s751_s13, %s751_s13, %s752_s14  }
  0x45   :  { %741 = dma.done.wait [#allocation3], 128  }
  0x46   :  { %742 = vsyncadd [#allocation3], 4294967168 }
  0x47   :  { %743 = dma.done.wait [#allocation6], 2176  }
  0x48   :  { %744 = vsyncadd [#allocation6], 4294965120 }
  0x49   :  { %745 = dma.done.wait [#allocation9], 2048  }
  0x4a   :  { %746 = vsyncadd [#allocation9], 4294965248  ;;  %v757_v0 = vmov 0.0   ;;  %vm758_vm0 = vmmov 0   ;;  %vm108_vm1 = vcmask 1044480   ;;  %v590_v2 = vld [vmem:[#allocation2] sm:$0xff]   ;;  %v174_v47 = vlaneseq }
  0x4b   :  { %571 = vmatprep.subr.bf16.mxu0 %v757_v0  ;;  %573 = vmatprep.mubr.msk.bf16.mxu0 %vm758_vm0, %v757_v0  ;;  %v589_v1 = vld [vmem:[#allocation5] sm:$0x1f]   ;;  %v591_v4 = vld [vmem:[#allocation7 + $0x4] ss:$8 sps:$4 sm:$0xff]   ;;  %vm104_vm2 = vcmask 80896   ;;  %v759_v20 = vmov 0  }
  0x4c   :  { %v110_v3 = vsel %vm108_vm1, %v589_v1, 0  ;;  %v593_v5 = vld [vmem:[#allocation7] ss:$8 sps:$4 sm:$0xff]   ;;  %264 = vmatprep.subr.bf16.mxu1 %v591_v4  ;;  %v594_v6 = vld [vmem:[#allocation7 + $0x14] ss:$8 sps:$4 sm:$0xff]   ;;  %296 = vmatprep.mubr.bf16.mxu1 %v759_v20  ;;  %v175_v48 = vshrl.u32 %v174_v47, 7 }
  0x4d   :  { %572 = vmatpush3.bf16.msra.mxu0 %v110_v3  ;;  %265 = vmatpush1.bf16.msra.mxu1 %v593_v5  ;;  %v596_v7 = vld [vmem:[#allocation7 + $0x10] ss:$8 sps:$4 sm:$0xff]   ;;  %v597_v8 = vld [vmem:[#allocation7 + $0x24] ss:$8 sps:$4 sm:$0xff]   ;;  %v599_v9 = vld [vmem:[#allocation7 + $0x20] ss:$8 sps:$4 sm:$0xff]  }
  0x4e   :  { %266 = vmatprep.subr.bf16.mxu1 %v594_v6  ;;  %v600_v10 = vld [vmem:[#allocation7 + $0x34] ss:$8 sps:$4 sm:$0xff]   ;;  %v602_v11 = vld [vmem:[#allocation7 + $0x30] ss:$8 sps:$4 sm:$0xff]   ;;  %v603_v12 = vld [vmem:[#allocation7 + $0x44] ss:$8 sps:$4 sm:$0xff]  }
  0x4f   :  { %v605_v13 = vld [vmem:[#allocation7 + $0x40] ss:$8 sps:$4 sm:$0xff]   ;;  %v606_v14 = vld [vmem:[#allocation7 + $0x54] ss:$8 sps:$4 sm:$0xff]   ;;  %v608_v15 = vld [vmem:[#allocation7 + $0x50] ss:$8 sps:$4 sm:$0xff]  }
  0x50   :  { %574 = vmatmul.mubr.msk.bf16.vlgmr.msra.gmra.mrb[0].mxu0 %vm104_vm2, %v590_v2  ;;  %v609_v16 = vld [vmem:[#allocation7 + $0x64] ss:$8 sps:$4 sm:$0xff]   ;;  %v611_v17 = vld [vmem:[#allocation7 + $0x60] ss:$8 sps:$4 sm:$0xff]   ;;  %v612_v18 = vld [vmem:[#allocation7 + $0x74] ss:$8 sps:$4 sm:$0xff]  }
  0x51   :  { %267 = vmatpush1.bf16.msra.mxu1 %v596_v7  ;;  %v614_v19 = vld [vmem:[#allocation7 + $0x70] ss:$8 sps:$4 sm:$0xff]   ;;  %v615_v21 = vld [vmem:[#allocation8 + $0x40] sm:$0xff]   ;;  %v617_v23 = vld [vmem:[#allocation8 + $0x48] sm:$0xff]   ;;  %v176_v49 = vsub.s32 0, %v175_v48  ;;  %v180_v51 = vsub.s32 1, %v175_v48 }
  0x52   :  { %268 = vmatprep.subr.bf16.mxu1 %v597_v8  ;;  %v616_v22 = vld [vmem:[#allocation8] sm:$0xff]   ;;  %549 = vmatprep.subr.bf16.mxu0 %v615_v21  ;;  %v618_v24 = vld [vmem:[#allocation8 + $0x8] sm:$0xff]   ;;  %v619_v25 = vld [vmem:[#allocation8 + $0x50] sm:$0xff]   ;;  %s760_s30 = smov [#allocation10]  }
  0x53   :  { %550 = vmatpush3.bf16.msra.mxu0 %v616_v22  ;;  %v620_v26 = vld [vmem:[#allocation8 + $0x10] sm:$0xff]   ;;  %v621_v27 = vld [vmem:[#allocation8 + $0x58] sm:$0xff]   ;;  %v623_v29 = vld [vmem:[#allocation8 + $0x60] sm:$0xff]   ;;  %s496_s8 = sshll.u32 %s760_s30, 4  ;;  %s497_s8 = int_to_ptr.vmem [resolvable:$true] %s496_s8 }
  0x54   :  { %551 = vmatprep.subr.bf16.mxu0 %v617_v23  ;;  %v622_v28 = vld [vmem:[#allocation8 + $0x18] sm:$0xff]   ;;  %v624_v30 = vld [vmem:[#allocation8 + $0x20] sm:$0xff]   ;;  %v625_v31 = vld [vmem:[#allocation8 + $0x68] sm:$0xff]   ;;  %s719_s9 = scalar_lea.vmem %s497_s8, 256  ;;  %p724_p5 = scmp.lt.s32.totalorder %s497_s8, %s497_s8 }
  0x55   :  { %269 = vmatpush1.bf16.msra.mxu1 %v599_v9  ;;  %v510_v32 = vld [vmem:[%s894_s2] ss:$0 sm:$0xff]  ;;  %v626_v42 = vld [vmem:[#allocation8 + $0x28] sm:$0xff]   ;;  %v629_v45 = vld [vmem:[#allocation8 + $0x78] sm:$0xff]   ;;  %p720_p4 = scmp.ne.s32.totalorder %s497_s8, %s719_s9  ;;  %p725_p6 = scmp.lt.s32.totalorder %s719_s9, %s719_s9 }
  0x56   :  { %270 = vmatprep.subr.bf16.mxu1 %v600_v10  ;;  %v627_v43 = vld [vmem:[#allocation8 + $0x70] sm:$0xff]   ;;  %v630_v46 = vld [vmem:[#allocation8 + $0x38] sm:$0xff]  }
  0x57   :  { %552 = vmatpush3.bf16.msra.mxu0 %v618_v24  ;;  %v628_v44 = vld [vmem:[#allocation8 + $0x30] sm:$0xff]   ;;  %p726_p7 = por %p725_p6, %p724_p5 }
  0x58   :  { %553 = vmatprep.subr.bf16.mxu0 %v619_v25  ;;  %v172_v50 = vld [vmem:[%s896_s4] sm:$0x3] }
  0x59   :  { %271 = vmatpush1.bf16.msra.mxu1 %v602_v11  ;;  %v177_v52 = vrot.slane %v172_v50, %v176_v49  ;;  %v181_v53 = vrot.slane %v172_v50, %v180_v51  ;;  %v530_v5 = vld [vmem:[%s898_s6] ss:$0 sm:$0xff]  ;;  %p727_p8 = pnand %p726_p7, %p720_p4 }
  0x5a   :  { %272 = vmatprep.subr.bf16.mxu1 %v603_v12 }
  0x5b   :  { %554 = vmatpush3.bf16.msra.mxu0 %v620_v26 }
  0x5c   :  { %555 = vmatprep.subr.bf16.mxu0 %v621_v27 }
  0x5d   :  { %273 = vmatpush1.bf16.msra.mxu1 %v605_v13 }
  0x5e   :  { %274 = vmatprep.subr.bf16.mxu1 %v606_v14 }
  0x5f   :  { %556 = vmatpush3.bf16.msra.mxu0 %v622_v28 }
  0x60   :  { %557 = vmatprep.subr.bf16.mxu0 %v623_v29 }
  0x61   :  { %275 = vmatpush1.bf16.msra.mxu1 %v608_v15 }
  0x62   :  { %276 = vmatprep.subr.bf16.mxu1 %v609_v16 }
  0x63   :  { %558 = vmatpush3.bf16.msra.mxu0 %v624_v30 }
  0x64   :  { %559 = vmatprep.subr.bf16.mxu0 %v625_v31 }
  0x65   :  { %277 = vmatpush1.bf16.msra.mxu1 %v611_v17 }
  0x66   :  { %278 = vmatprep.subr.bf16.mxu1 %v612_v18 }
  0x67   :  { %560 = vmatpush3.bf16.msra.mxu0 %v626_v42 }
  0x68   :  { %561 = vmatprep.subr.bf16.mxu0 %v627_v43 }
  0x69   :  { %279 = vmatpush1.bf16.msra.mxu1 %v614_v19 }
  0x6b   :  { %562 = vmatpush3.bf16.msra.mxu0 %v628_v44 }
  0x6c   :  { %563 = vmatprep.subr.bf16.mxu0 %v629_v45 }
  0x6f   :  { %564 = vmatpush3.bf16.msra.mxu0 %v630_v46 }
 0x123   :  { %v146_v33 = vpop.f32.mrb[0].mxu0 }
 0x124   :  { %v147_v34 = vadd.f32 %v510_v32, %v146_v33  ;;  %v575_v35 = vpop.f32.mrb[1].mxu0 }
 0x125   :  { %v149_v36 = vpop.f32.mrb[2].mxu0 }
 0x126   :  { %v150_v37 = vadd.f32 %v510_v32, %v149_v36  ;;  %v576_v38 = vpop.f32.mrb[3].mxu0  ;;  %v153_v39 = vmax.f32 %v147_v34, 0.0 }
 0x128   :  { %v154_v40 = vmax.f32 %v150_v37, 0.0 }
 0x12a   :  { %v155_v41 = vpack.c.bf16 %v154_v40, %v153_v39 }
 0x12c   :  { %297 = vmatmul.mubr.bf16.vlgmr.msra.gmra.mrb[0].mxu1 %v155_v41 }
 0x1ff   :  { %v298_v54 = vpop.f32.mrb[0].mxu1 }
 0x200   :  { %v299_v55 = vadd.f32 %v298_v54, %v177_v52  ;;  %v300_v56 = vpop.f32.mrb[1].mxu1 }
 0x201   :  { %v301_v57 = vadd.f32 %v300_v56, %v181_v53  ;;  %v302_v58 = vpop.f32.mrb[2].mxu1 }
 0x202   :  { %v303_v59 = vadd.f32 %v302_v58, %v177_v52  ;;  %v304_v60 = vpop.f32.mrb[3].mxu1  ;;  %v307_v62 = vmax.f32 %v299_v55, 0.0 }
 0x203   :  { %v305_v61 = vadd.f32 %v304_v60, %v181_v53  ;;  %v308_v0 = vmax.f32 %v301_v57, 0.0 }
 0x204   :  { %v309_v63 = vmax.f32 %v303_v59, 0.0 }
 0x205   :  { %v310_v1 = vmax.f32 %v305_v61, 0.0 }
 0x206   :  { %v311_v2 = vpack.c.bf16 %v309_v63, %v307_v62 }
 0x207   :  { %v312_v3 = vpack.c.bf16 %v310_v1, %v308_v0 }
 0x209   :  { %480 = vmatprep.mubr.bf16.mxu0 %v312_v3 }
 0x20a   :  { %481 = vmatmul.mubr.bf16.vlgmr.msra.gmra.mrb[4].mxu0 %v311_v2 }
 0x2dd   :  { %v565_v4 = vpop.f32.mrb[4].mxu0 }
 0x2de   :  { %v566_v6 = vpop.f32.mrb[5].mxu0 }
 0x2df   :  { %v567_v7 = vadd.f32 %v566_v6, %v565_v4  ;;  %v568_v8 = vpop.f32.mrb[6].mxu0 }
 0x2e0   :  { %v569_v9 = vpop.f32.mrb[7].mxu0 }
 0x2e1   :  { %v483_v10 = vadd.f32 %v567_v7, %v530_v5  ;;  %v570_v11 = vadd.f32 %v569_v9, %v568_v8 }
 0x2e3   :  { %489 = vst [vmem:[#allocation10] sm:$0xff] %v483_v10  ;;  %v486_v12 = vadd.f32 %v570_v11, %v530_v5 }
 0x2e5   :  { %490 = vst [vmem:[#allocation10 + $0x8] sm:$0xff] %v486_v12 }
 0x2e6   :  { %730 = shalt.err (!%p727_p8)
}
 0x2e7   :  { %s731_s11 = scalar_lea.hbm %s899_s7, 256 }
 0x2e8   :  { %p732_p9 = scmp.ne.s32.totalorder %s899_s7, %s731_s11  ;;  %p735_p10 = scmp.lt.u32.totalorder %s731_s11, %s899_s7 }
 0x2ea   :  { %p737_p11 = pnand %p735_p10, %p732_p9 }
 0x2ec   :  { %740 = shalt.err (!%p737_p11)
}
 0x2ed   :  { %502 = dma.vmem_to_hbm [thread:$0]  %s497_s8, 256, %s899_s7, [#allocation4], %s754_s0, %s754_s0, %s755_s27  }
 0x2ee   :  { %747 = dma.done.wait [#allocation4], 256  }
 0x2ef   :  { %748 = vsyncadd [#allocation4], 4294967040 }
 0x2f0   :  { %506 = vsyncpa [#allocation3], 1 }
 0x2f1   :  { %507 = vsyncpa [#allocation6], 1 }
 0x2f2   :  { %508 = vsyncpa [#allocation9], 1 }
 0x2f3   :  { %509 = vsyncpa [#allocation4], 1 }

</bundles_post_ra>
